<compile_context>
chip_gen: v7x
topology: tpu7x:2x2x1
jax: 0.10.0
libtpu: 0.0.40
codegen_flags: <defaults>
</compile_context>

<pallas_src>
import functools

import jax
import jax.numpy as jnp
import numpy as np
from jax.experimental import pallas as pl
from jax.experimental.pallas import tpu as pltpu


def _fused_upconv_bn_lrelu_kernel(patch_ref, w_ref, b_ref, gamma_ref, beta_ref,
                                  out_ref, y_scr, sum_scr, sq_scr,
                                  *, count, eps, slope):
    """Grid = (pass, batch). pass 0: conv(+bias) + batch-stat accumulation into
    VMEM scratch. pass 1: fold stats+gamma/beta into scale/shift, LeakyReLU,
    write final per-phase output (lane-dense [Cout, H*W])."""
    p = pl.program_id(0)          # 0 = conv+stats pass, 1 = normalize pass
    n = pl.program_id(1)          # batch index

    @pl.when(jnp.logical_and(p == 0, n == 0))
    def _init():
        sum_scr[...] = jnp.zeros_like(sum_scr)
        sq_scr[...] = jnp.zeros_like(sq_scr)

    @pl.when(p == 0)
    def _conv_pass():
        for ph in range(4):                               # 4 output parities
            # (Cout, 4*Cin) @ (4*Cin, H*W) -> (Cout, H*W), bf16 in / f32 acc.
            acc = jnp.dot(w_ref[ph], patch_ref[0, ph],
                          preferred_element_type=jnp.float32)
            acc = acc + b_ref[...]                        # conv-transpose bias
            y_scr[n, ph] = acc                            # stays in VMEM
            sum_scr[...] += jnp.sum(acc, axis=1, keepdims=True)
            sq_scr[...] += jnp.sum(acc * acc, axis=1, keepdims=True)

    @pl.when(p == 1)
    def _bn_lrelu_pass():
        inv_cnt = 1.0 / count
        mean = sum_scr[...] * inv_cnt                     # (Cout, 1)
        var = sq_scr[...] * inv_cnt - mean * mean         # biased var (PyTorch fwd)
        scale = gamma_ref[...] * jax.lax.rsqrt(var + eps)
        shift = beta_ref[...] - mean * scale
        for ph in range(4):
            v = y_scr[n, ph] * scale + shift
            out_ref[0, ph] = jnp.where(v >= 0.0, v, slope * v)


def dcgan_upconv_forward(x_nchw, w_t, b, gamma, beta, *, eps=1e-5, slope=0.2):
    """x_nchw: (N, nin, H, W) f32 -> (N, nout, 2H, 2W) f32.
    BatchNorm uses training-mode (batch) statistics, matching a freshly
    constructed nn.Module called in its default training state."""
    N, Cin, H, W = x_nchw.shape
    Cin_w, Cout, K, K2 = w_t.shape
    assert (Cin_w, K, K2) == (Cin, 4, 4)
    OH, OW = 2 * H, 2 * W
    HW = H * W
    KC = 4 * Cin                                          # per-phase contraction

    # ---- glue (plain JAX, small tensors): polyphase im2col + weight gather --
    # out[2i+py, 2j+px, co] = b[co] +
    #   sum_{wa,wb,ci} xpad[ci, i+py+wa, j+px+wb] * Wt[ci, co, 3-py-2wa, 3-px-2wb]
    xp = jnp.pad(x_nchw.astype(jnp.float32), ((0, 0), (0, 0), (1, 1), (1, 1)))
    phase_patches, phase_weights = [], []
    for py in range(2):
        for px in range(2):
            taps_x, taps_w = [], []
            for wa in range(2):
                for wb in range(2):
                    taps_x.append(xp[:, :, py + wa:py + wa + H,
                                     px + wb:px + wb + W])          # (N,Cin,H,W)
                    taps_w.append(w_t[:, :, 3 - py - 2 * wa,
                                      3 - px - 2 * wb])             # (Cin,Cout)
            phase_patches.append(jnp.stack(taps_x, axis=1).reshape(N, KC, HW))
            phase_weights.append(jnp.stack(taps_w, axis=0).reshape(KC, Cout).T)
    patches = jnp.stack(phase_patches, axis=1).astype(jnp.bfloat16)  # (N,4,KC,HW)
    w_ph = jnp.stack(phase_weights, axis=0).astype(jnp.bfloat16)     # (4,Cout,KC)

    b2 = b.reshape(Cout, 1).astype(jnp.float32)
    gamma2 = gamma.reshape(Cout, 1).astype(jnp.float32)
    beta2 = beta.reshape(Cout, 1).astype(jnp.float32)
    count = float(N * OH * OW)

    kernel = functools.partial(_fused_upconv_bn_lrelu_kernel,
                               count=count, eps=eps, slope=slope)

    # grid iterates n fastest: all of pass 0 (conv+stats) then all of pass 1.
    # Input index is pinned during pass 1 and the output index is pinned to
    # block 0 during pass 0, so neither gets spurious DMA traffic.
    out_ph = pl.pallas_call(
        kernel,
        out_shape=jax.ShapeDtypeStruct((N, 4, Cout, HW), jnp.float32),
        grid=(2, N),
        in_specs=[
            pl.BlockSpec((1, 4, KC, HW),
                         lambda p, n: (n * (1 - p) + (N - 1) * p, 0, 0, 0)),
            pl.BlockSpec((4, Cout, KC), lambda p, n: (0, 0, 0)),
            pl.BlockSpec((Cout, 1), lambda p, n: (0, 0)),
            pl.BlockSpec((Cout, 1), lambda p, n: (0, 0)),
            pl.BlockSpec((Cout, 1), lambda p, n: (0, 0)),
        ],
        out_specs=pl.BlockSpec((1, 4, Cout, HW), lambda p, n: (n * p, 0, 0, 0)),
        scratch_shapes=[
            pltpu.VMEM((N, 4, Cout, HW), jnp.float32),   # batch-resident y
            pltpu.VMEM((Cout, 1), jnp.float32),          # per-channel sum
            pltpu.VMEM((Cout, 1), jnp.float32),          # per-channel sum-of-squares
        ],
        compiler_params=pltpu.CompilerParams(
            dimension_semantics=("arbitrary", "arbitrary")),
    )(patches, w_ph, b2, gamma2, beta2)

    # Interleave the 4 parities back to (N, Cout, OH, OW):
    # out[n, co, 2i+py, 2j+px] = out_ph[n, 2*py+px, co, i*W+j]
    out = out_ph.reshape(N, 2, 2, Cout, H, W)
    out = jnp.transpose(out, (0, 3, 4, 1, 5, 2)).reshape(N, Cout, OH, OW)
    return out


def reference_forward(x, w_t, b, gamma, beta, eps=1e-5, slope=0.2,
                      conv_dtype=jnp.float32):
    """Pure-JAX reference for ConvTranspose2d(4,2,1) -> BatchNorm2d (training
    stats) -> LeakyReLU(0.2). `conv_dtype` controls the conv operand precision
    (f32, or bf16 to match the kernel's MXU numerics)."""
    xc = x.astype(conv_dtype)
    wc = jnp.transpose(w_t[:, :, ::-1, ::-1], (1, 0, 2, 3)).astype(conv_dtype)
    y = jax.lax.conv_general_dilated(
        xc, wc, window_strides=(1, 1), padding=[(2, 2), (2, 2)],
        lhs_dilation=(2, 2), dimension_numbers=("NCHW", "OIHW", "NCHW"),
        preferred_element_type=jnp.float32)
    y = y + b.reshape(1, -1, 1, 1)
    mu = jnp.mean(y, axis=(0, 2, 3), keepdims=True)
    var = jnp.mean((y - mu) ** 2, axis=(0, 2, 3), keepdims=True)
    yn = (y - mu) / jnp.sqrt(var + eps) * gamma.reshape(1, -1, 1, 1) \
        + beta.reshape(1, -1, 1, 1)
    return jnp.where(yn >= 0, yn, slope * yn)


if __name__ == "__main__":
    key = jax.random.PRNGKey(0)
    k1, k2, k3, k4, k5 = jax.random.split(key, 5)

    N, nin, nout, H, W = 2, 4, 8, 16, 16
    x = jax.random.normal(k1, (N, nin, H, W), jnp.float32)
    # ConvTranspose2d(nin, nout, 4) params: weight (nin, nout, 4, 4), bias (nout,)
    w_t = 0.1 * jax.random.normal(k2, (nin, nout, 4, 4), jnp.float32)
    b = 0.1 * jax.random.normal(k3, (nout,), jnp.float32)
    # BatchNorm2d(nout) affine params
    gamma = 1.0 + 0.1 * jax.random.normal(k4, (nout,), jnp.float32)
    beta = 0.1 * jax.random.normal(k5, (nout,), jnp.float32)

    out = jax.block_until_ready(dcgan_upconv_forward(x, w_t, b, gamma, beta))
    assert out.shape == (N, nout, 2 * H, 2 * W), out.shape

    # Strict check vs. a reference with matching matmul numerics (bf16 operands,
    # f32 accumulation), plus a looser check vs. the pure-f32 reference that
    # bounds the bf16 quantization error.
    ref_bf16 = reference_forward(x, w_t, b, gamma, beta, conv_dtype=jnp.bfloat16)
    ref_f32 = reference_forward(x, w_t, b, gamma, beta, conv_dtype=jnp.float32)
    np.testing.assert_allclose(np.asarray(out), np.asarray(ref_bf16),
                               rtol=2e-3, atol=2e-3)
    np.testing.assert_allclose(np.asarray(out), np.asarray(ref_f32),
                               rtol=5e-2, atol=5e-2)
    print("KERNEL_OK")
</pallas_src>

<mosaic_0001>
module attributes {stable_mosaic.version = 11 : i64} {
  func.func @_fused_upconv_bn_lrelu_kernel(%arg0: i32, %arg1: i32, %arg2: memref<1x4x16x256xbf16, #tpu.memory_space<vmem>>, %arg3: memref<4x8x16xbf16, #tpu.memory_space<vmem>>, %arg4: memref<8x1xf32, #tpu.memory_space<vmem>>, %arg5: memref<8x1xf32, #tpu.memory_space<vmem>>, %arg6: memref<8x1xf32, #tpu.memory_space<vmem>>, %arg7: memref<1x4x8x256xf32, #tpu.memory_space<vmem>>, %arg8: memref<2x4x8x256xf32, #tpu.memory_space<vmem>>, %arg9: memref<8x1xf32, #tpu.memory_space<vmem>>, %arg10: memref<8x1xf32, #tpu.memory_space<vmem>>) attributes {dimension_semantics = [#tpu.dimension_semantics<arbitrary>, #tpu.dimension_semantics<arbitrary>], iteration_bounds = array<i64: 2, 2>, scalar_prefetch = 0 : i64, scratch_operands = 3 : i64, tpu.core_type = #tpu.core_type<tc>, window_params = [{transform_indices = @transform_0, window_bounds = array<i64: 1, 4, 16, 256>}, {pipeline_mode = #tpu.pipeline_mode<synchronous>, transform_indices = @transform_1, window_bounds = array<i64: 4, 8, 16>}, {pipeline_mode = #tpu.pipeline_mode<synchronous>, transform_indices = @transform_2, window_bounds = array<i64: 8, 1>}, {pipeline_mode = #tpu.pipeline_mode<synchronous>, transform_indices = @transform_3, window_bounds = array<i64: 8, 1>}, {pipeline_mode = #tpu.pipeline_mode<synchronous>, transform_indices = @transform_4, window_bounds = array<i64: 8, 1>}, {transform_indices = @transform_5, window_bounds = array<i64: 1, 4, 8, 256>}]} {
    %c0_i32 = arith.constant 0 : i32
    %0 = arith.cmpi eq, %arg0, %c0_i32 : i32
    %c0_i32_0 = arith.constant 0 : i32
    %1 = arith.cmpi eq, %arg1, %c0_i32_0 : i32
    %2 = arith.andi %0, %1 : i1
    %3 = arith.extui %2 : i1 to i32
    %c0_i32_1 = arith.constant 0 : i32
    %4 = arith.cmpi ne, %3, %c0_i32_1 : i32
    scf.if %4 {
      %cst = arith.constant 0.000000e+00 : f32
      %11 = vector.broadcast %cst : f32 to vector<8x1xf32>
      %c0 = arith.constant 0 : index
      %c0_5 = arith.constant 0 : index
      %12 = vector.load %arg9[%c0, %c0_5] : memref<8x1xf32, #tpu.memory_space<vmem>>, vector<8x1xf32>
      tpu.vector_store %arg9[%c0, %c0_5], %11 {strides = array<i32>} : memref<8x1xf32, #tpu.memory_space<vmem>>, vector<8x1xf32>,
      %cst_6 = arith.constant 0.000000e+00 : f32
      %13 = vector.broadcast %cst_6 : f32 to vector<8x1xf32>
      %c0_7 = arith.constant 0 : index
      %c0_8 = arith.constant 0 : index
      %14 = vector.load %arg10[%c0_7, %c0_8] : memref<8x1xf32, #tpu.memory_space<vmem>>, vector<8x1xf32>
      tpu.vector_store %arg10[%c0_7, %c0_8], %13 {strides = array<i32>} : memref<8x1xf32, #tpu.memory_space<vmem>>, vector<8x1xf32>,
    } else {
    }
    %c0_i32_2 = arith.constant 0 : i32
    %5 = arith.cmpi eq, %arg0, %c0_i32_2 : i32
    %6 = arith.extui %5 : i1 to i32
    %c0_i32_3 = arith.constant 0 : i32
    %7 = arith.cmpi ne, %6, %c0_i32_3 : i32
    scf.if %7 {
      %c0 = arith.constant 0 : index
      %c0_5 = arith.constant 0 : index
      %c0_6 = arith.constant 0 : index
      %11 = vector.load %arg3[%c0, %c0_5, %c0_6] : memref<4x8x16xbf16, #tpu.memory_space<vmem>>, vector<1x8x16xbf16>
      %12 = vector.shape_cast %11 : vector<1x8x16xbf16> to vector<8x16xbf16>
      %c0_7 = arith.constant 0 : index
      %c0_8 = arith.constant 0 : index
      %c0_9 = arith.constant 0 : index
      %c0_10 = arith.constant 0 : index
      %13 = vector.load %arg2[%c0_7, %c0_8, %c0_9, %c0_10] : memref<1x4x16x256xbf16, #tpu.memory_space<vmem>>, vector<1x1x16x256xbf16>
      %14 = vector.shape_cast %13 : vector<1x1x16x256xbf16> to vector<16x256xbf16>
      %cst = arith.constant dense<0.000000e+00> : vector<8x256xf32>
      %15 = tpu.matmul %12, %14, %cst {dimension_numbers = #tpu.dot_dimension_numbers<[1], [0], [0], [1], [0, 0, 1, 1], [], []>} : vector<8x16xbf16>, vector<16x256xbf16>, vector<8x256xf32> -> vector<8x256xf32>
      %c0_11 = arith.constant 0 : index
      %c0_12 = arith.constant 0 : index
      %16 = vector.load %arg4[%c0_11, %c0_12] : memref<8x1xf32, #tpu.memory_space<vmem>>, vector<8x1xf32>
      %17 = vector.broadcast %16 : vector<8x1xf32> to vector<8x256xf32>
      %18 = arith.addf %15, %17 : vector<8x256xf32>
      %19 = arith.index_cast %arg1 : i32 to index
      %c0_13 = arith.constant 0 : index
      %c0_14 = arith.constant 0 : index
      %c0_15 = arith.constant 0 : index
      %20 = vector.load %arg8[%19, %c0_13, %c0_14, %c0_15] : memref<2x4x8x256xf32, #tpu.memory_space<vmem>>, vector<1x1x8x256xf32>
      %21 = vector.shape_cast %20 : vector<1x1x8x256xf32> to vector<8x256xf32>
      %22 = vector.shape_cast %18 : vector<8x256xf32> to vector<1x1x8x256xf32>
      tpu.vector_store %arg8[%19, %c0_13, %c0_14, %c0_15], %22 {strides = array<i32>} : memref<2x4x8x256xf32, #tpu.memory_space<vmem>>, vector<1x1x8x256xf32>,
      %c0_16 = arith.constant 0 : index
      %c0_17 = arith.constant 0 : index
      %23 = vector.load %arg9[%c0_16, %c0_17] : memref<8x1xf32, #tpu.memory_space<vmem>>, vector<8x1xf32>
      %cst_18 = arith.constant dense<0.000000e+00> : vector<8xf32>
      %24 = vector.multi_reduction <add>, %18, %cst_18 [1] : vector<8x256xf32> to vector<8xf32>
      %25 = vector.shape_cast %24 : vector<8xf32> to vector<8x1xf32>
      %26 = arith.addf %23, %25 : vector<8x1xf32>
      %c0_19 = arith.constant 0 : index
      %c0_20 = arith.constant 0 : index
      %27 = vector.load %arg9[%c0_19, %c0_20] : memref<8x1xf32, #tpu.memory_space<vmem>>, vector<8x1xf32>
      tpu.vector_store %arg9[%c0_19, %c0_20], %26 {strides = array<i32>} : memref<8x1xf32, #tpu.memory_space<vmem>>, vector<8x1xf32>,
      %c0_21 = arith.constant 0 : index
      %c0_22 = arith.constant 0 : index
      %28 = vector.load %arg10[%c0_21, %c0_22] : memref<8x1xf32, #tpu.memory_space<vmem>>, vector<8x1xf32>
      %29 = arith.mulf %18, %18 : vector<8x256xf32>
      %cst_23 = arith.constant dense<0.000000e+00> : vector<8xf32>
      %30 = vector.multi_reduction <add>, %29, %cst_23 [1] : vector<8x256xf32> to vector<8xf32>
      %31 = vector.shape_cast %30 : vector<8xf32> to vector<8x1xf32>
      %32 = arith.addf %28, %31 : vector<8x1xf32>
      %c0_24 = arith.constant 0 : index
      %c0_25 = arith.constant 0 : index
      %33 = vector.load %arg10[%c0_24, %c0_25] : memref<8x1xf32, #tpu.memory_space<vmem>>, vector<8x1xf32>
      tpu.vector_store %arg10[%c0_24, %c0_25], %32 {strides = array<i32>} : memref<8x1xf32, #tpu.memory_space<vmem>>, vector<8x1xf32>,
      %c1 = arith.constant 1 : index
      %c0_26 = arith.constant 0 : index
      %c0_27 = arith.constant 0 : index
      %34 = vector.load %arg3[%c1, %c0_26, %c0_27] : memref<4x8x16xbf16, #tpu.memory_space<vmem>>, vector<1x8x16xbf16>
      %35 = vector.shape_cast %34 : vector<1x8x16xbf16> to vector<8x16xbf16>
      %c0_28 = arith.constant 0 : index
      %c1_29 = arith.constant 1 : index
      %c0_30 = arith.constant 0 : index
      %c0_31 = arith.constant 0 : index
      %36 = vector.load %arg2[%c0_28, %c1_29, %c0_30, %c0_31] : memref<1x4x16x256xbf16, #tpu.memory_space<vmem>>, vector<1x1x16x256xbf16>
      %37 = vector.shape_cast %36 : vector<1x1x16x256xbf16> to vector<16x256xbf16>
      %cst_32 = arith.constant dense<0.000000e+00> : vector<8x256xf32>
      %38 = tpu.matmul %35, %37, %cst_32 {dimension_numbers = #tpu.dot_dimension_numbers<[1], [0], [0], [1], [0, 0, 1, 1], [], []>} : vector<8x16xbf16>, vector<16x256xbf16>, vector<8x256xf32> -> vector<8x256xf32>
      %c0_33 = arith.constant 0 : index
      %c0_34 = arith.constant 0 : index
      %39 = vector.load %arg4[%c0_33, %c0_34] : memref<8x1xf32, #tpu.memory_space<vmem>>, vector<8x1xf32>
      %40 = vector.broadcast %39 : vector<8x1xf32> to vector<8x256xf32>
      %41 = arith.addf %38, %40 : vector<8x256xf32>
      %42 = arith.index_cast %arg1 : i32 to index
      %c1_35 = arith.constant 1 : index
      %c0_36 = arith.constant 0 : index
      %c0_37 = arith.constant 0 : index
      %43 = vector.load %arg8[%42, %c1_35, %c0_36, %c0_37] : memref<2x4x8x256xf32, #tpu.memory_space<vmem>>, vector<1x1x8x256xf32>
      %44 = vector.shape_cast %43 : vector<1x1x8x256xf32> to vector<8x256xf32>
      %45 = vector.shape_cast %41 : vector<8x256xf32> to vector<1x1x8x256xf32>
      tpu.vector_store %arg8[%42, %c1_35, %c0_36, %c0_37], %45 {strides = array<i32>} : memref<2x4x8x256xf32, #tpu.memory_space<vmem>>, vector<1x1x8x256xf32>,
      %c0_38 = arith.constant 0 : index
      %c0_39 = arith.constant 0 : index
      %46 = vector.load %arg9[%c0_38, %c0_39] : memref<8x1xf32, #tpu.memory_space<vmem>>, vector<8x1xf32>
      %cst_40 = arith.constant dense<0.000000e+00> : vector<8xf32>
      %47 = vector.multi_reduction <add>, %41, %cst_40 [1] : vector<8x256xf32> to vector<8xf32>
      %48 = vector.shape_cast %47 : vector<8xf32> to vector<8x1xf32>
      %49 = arith.addf %46, %48 : vector<8x1xf32>
      %c0_41 = arith.constant 0 : index
      %c0_42 = arith.constant 0 : index
      %50 = vector.load %arg9[%c0_41, %c0_42] : memref<8x1xf32, #tpu.memory_space<vmem>>, vector<8x1xf32>
      tpu.vector_store %arg9[%c0_41, %c0_42], %49 {strides = array<i32>} : memref<8x1xf32, #tpu.memory_space<vmem>>, vector<8x1xf32>,
      %c0_43 = arith.constant 0 : index
      %c0_44 = arith.constant 0 : index
      %51 = vector.load %arg10[%c0_43, %c0_44] : memref<8x1xf32, #tpu.memory_space<vmem>>, vector<8x1xf32>
      %52 = arith.mulf %41, %41 : vector<8x256xf32>
      %cst_45 = arith.constant dense<0.000000e+00> : vector<8xf32>
      %53 = vector.multi_reduction <add>, %52, %cst_45 [1] : vector<8x256xf32> to vector<8xf32>
      %54 = vector.shape_cast %53 : vector<8xf32> to vector<8x1xf32>
      %55 = arith.addf %51, %54 : vector<8x1xf32>
      %c0_46 = arith.constant 0 : index
      %c0_47 = arith.constant 0 : index
      %56 = vector.load %arg10[%c0_46, %c0_47] : memref<8x1xf32, #tpu.memory_space<vmem>>, vector<8x1xf32>
      tpu.vector_store %arg10[%c0_46, %c0_47], %55 {strides = array<i32>} : memref<8x1xf32, #tpu.memory_space<vmem>>, vector<8x1xf32>,
      %c2 = arith.constant 2 : index
      %c0_48 = arith.constant 0 : index
      %c0_49 = arith.constant 0 : index
      %57 = vector.load %arg3[%c2, %c0_48, %c0_49] : memref<4x8x16xbf16, #tpu.memory_space<vmem>>, vector<1x8x16xbf16>
      %58 = vector.shape_cast %57 : vector<1x8x16xbf16> to vector<8x16xbf16>
      %c0_50 = arith.constant 0 : index
      %c2_51 = arith.constant 2 : index
      %c0_52 = arith.constant 0 : index
      %c0_53 = arith.constant 0 : index
      %59 = vector.load %arg2[%c0_50, %c2_51, %c0_52, %c0_53] : memref<1x4x16x256xbf16, #tpu.memory_space<vmem>>, vector<1x1x16x256xbf16>
      %60 = vector.shape_cast %59 : vector<1x1x16x256xbf16> to vector<16x256xbf16>
      %cst_54 = arith.constant dense<0.000000e+00> : vector<8x256xf32>
      %61 = tpu.matmul %58, %60, %cst_54 {dimension_numbers = #tpu.dot_dimension_numbers<[1], [0], [0], [1], [0, 0, 1, 1], [], []>} : vector<8x16xbf16>, vector<16x256xbf16>, vector<8x256xf32> -> vector<8x256xf32>
      %c0_55 = arith.constant 0 : index
      %c0_56 = arith.constant 0 : index
      %62 = vector.load %arg4[%c0_55, %c0_56] : memref<8x1xf32, #tpu.memory_space<vmem>>, vector<8x1xf32>
      %63 = vector.broadcast %62 : vector<8x1xf32> to vector<8x256xf32>
      %64 = arith.addf %61, %63 : vector<8x256xf32>
      %65 = arith.index_cast %arg1 : i32 to index
      %c2_57 = arith.constant 2 : index
      %c0_58 = arith.constant 0 : index
      %c0_59 = arith.constant 0 : index
      %66 = vector.load %arg8[%65, %c2_57, %c0_58, %c0_59] : memref<2x4x8x256xf32, #tpu.memory_space<vmem>>, vector<1x1x8x256xf32>
      %67 = vector.shape_cast %66 : vector<1x1x8x256xf32> to vector<8x256xf32>
      %68 = vector.shape_cast %64 : vector<8x256xf32> to vector<1x1x8x256xf32>
      tpu.vector_store %arg8[%65, %c2_57, %c0_58, %c0_59], %68 {strides = array<i32>} : memref<2x4x8x256xf32, #tpu.memory_space<vmem>>, vector<1x1x8x256xf32>,
      %c0_60 = arith.constant 0 : index
      %c0_61 = arith.constant 0 : index
      %69 = vector.load %arg9[%c0_60, %c0_61] : memref<8x1xf32, #tpu.memory_space<vmem>>, vector<8x1xf32>
      %cst_62 = arith.constant dense<0.000000e+00> : vector<8xf32>
      %70 = vector.multi_reduction <add>, %64, %cst_62 [1] : vector<8x256xf32> to vector<8xf32>
      %71 = vector.shape_cast %70 : vector<8xf32> to vector<8x1xf32>
      %72 = arith.addf %69, %71 : vector<8x1xf32>
      %c0_63 = arith.constant 0 : index
      %c0_64 = arith.constant 0 : index
      %73 = vector.load %arg9[%c0_63, %c0_64] : memref<8x1xf32, #tpu.memory_space<vmem>>, vector<8x1xf32>
      tpu.vector_store %arg9[%c0_63, %c0_64], %72 {strides = array<i32>} : memref<8x1xf32, #tpu.memory_space<vmem>>, vector<8x1xf32>,
      %c0_65 = arith.constant 0 : index
      %c0_66 = arith.constant 0 : index
      %74 = vector.load %arg10[%c0_65, %c0_66] : memref<8x1xf32, #tpu.memory_space<vmem>>, vector<8x1xf32>
      %75 = arith.mulf %64, %64 : vector<8x256xf32>
      %cst_67 = arith.constant dense<0.000000e+00> : vector<8xf32>
      %76 = vector.multi_reduction <add>, %75, %cst_67 [1] : vector<8x256xf32> to vector<8xf32>
      %77 = vector.shape_cast %76 : vector<8xf32> to vector<8x1xf32>
      %78 = arith.addf %74, %77 : vector<8x1xf32>
      %c0_68 = arith.constant 0 : index
      %c0_69 = arith.constant 0 : index
      %79 = vector.load %arg10[%c0_68, %c0_69] : memref<8x1xf32, #tpu.memory_space<vmem>>, vector<8x1xf32>
      tpu.vector_store %arg10[%c0_68, %c0_69], %78 {strides = array<i32>} : memref<8x1xf32, #tpu.memory_space<vmem>>, vector<8x1xf32>,
      %c3 = arith.constant 3 : index
      %c0_70 = arith.constant 0 : index
      %c0_71 = arith.constant 0 : index
      %80 = vector.load %arg3[%c3, %c0_70, %c0_71] : memref<4x8x16xbf16, #tpu.memory_space<vmem>>, vector<1x8x16xbf16>
      %81 = vector.shape_cast %80 : vector<1x8x16xbf16> to vector<8x16xbf16>
      %c0_72 = arith.constant 0 : index
      %c3_73 = arith.constant 3 : index
      %c0_74 = arith.constant 0 : index
      %c0_75 = arith.constant 0 : index
      %82 = vector.load %arg2[%c0_72, %c3_73, %c0_74, %c0_75] : memref<1x4x16x256xbf16, #tpu.memory_space<vmem>>, vector<1x1x16x256xbf16>
      %83 = vector.shape_cast %82 : vector<1x1x16x256xbf16> to vector<16x256xbf16>
      %cst_76 = arith.constant dense<0.000000e+00> : vector<8x256xf32>
      %84 = tpu.matmul %81, %83, %cst_76 {dimension_numbers = #tpu.dot_dimension_numbers<[1], [0], [0], [1], [0, 0, 1, 1], [], []>} : vector<8x16xbf16>, vector<16x256xbf16>, vector<8x256xf32> -> vector<8x256xf32>
      %c0_77 = arith.constant 0 : index
      %c0_78 = arith.constant 0 : index
      %85 = vector.load %arg4[%c0_77, %c0_78] : memref<8x1xf32, #tpu.memory_space<vmem>>, vector<8x1xf32>
      %86 = vector.broadcast %85 : vector<8x1xf32> to vector<8x256xf32>
      %87 = arith.addf %84, %86 : vector<8x256xf32>
      %88 = arith.index_cast %arg1 : i32 to index
      %c3_79 = arith.constant 3 : index
      %c0_80 = arith.constant 0 : index
      %c0_81 = arith.constant 0 : index
      %89 = vector.load %arg8[%88, %c3_79, %c0_80, %c0_81] : memref<2x4x8x256xf32, #tpu.memory_space<vmem>>, vector<1x1x8x256xf32>
      %90 = vector.shape_cast %89 : vector<1x1x8x256xf32> to vector<8x256xf32>
      %91 = vector.shape_cast %87 : vector<8x256xf32> to vector<1x1x8x256xf32>
      tpu.vector_store %arg8[%88, %c3_79, %c0_80, %c0_81], %91 {strides = array<i32>} : memref<2x4x8x256xf32, #tpu.memory_space<vmem>>, vector<1x1x8x256xf32>,
      %c0_82 = arith.constant 0 : index
      %c0_83 = arith.constant 0 : index
      %92 = vector.load %arg9[%c0_82, %c0_83] : memref<8x1xf32, #tpu.memory_space<vmem>>, vector<8x1xf32>
      %cst_84 = arith.constant dense<0.000000e+00> : vector<8xf32>
      %93 = vector.multi_reduction <add>, %87, %cst_84 [1] : vector<8x256xf32> to vector<8xf32>
      %94 = vector.shape_cast %93 : vector<8xf32> to vector<8x1xf32>
      %95 = arith.addf %92, %94 : vector<8x1xf32>
      %c0_85 = arith.constant 0 : index
      %c0_86 = arith.constant 0 : index
      %96 = vector.load %arg9[%c0_85, %c0_86] : memref<8x1xf32, #tpu.memory_space<vmem>>, vector<8x1xf32>
      tpu.vector_store %arg9[%c0_85, %c0_86], %95 {strides = array<i32>} : memref<8x1xf32, #tpu.memory_space<vmem>>, vector<8x1xf32>,
      %c0_87 = arith.constant 0 : index
      %c0_88 = arith.constant 0 : index
      %97 = vector.load %arg10[%c0_87, %c0_88] : memref<8x1xf32, #tpu.memory_space<vmem>>, vector<8x1xf32>
      %98 = arith.mulf %87, %87 : vector<8x256xf32>
      %cst_89 = arith.constant dense<0.000000e+00> : vector<8xf32>
      %99 = vector.multi_reduction <add>, %98, %cst_89 [1] : vector<8x256xf32> to vector<8xf32>
      %100 = vector.shape_cast %99 : vector<8xf32> to vector<8x1xf32>
      %101 = arith.addf %97, %100 : vector<8x1xf32>
      %c0_90 = arith.constant 0 : index
      %c0_91 = arith.constant 0 : index
      %102 = vector.load %arg10[%c0_90, %c0_91] : memref<8x1xf32, #tpu.memory_space<vmem>>, vector<8x1xf32>
      tpu.vector_store %arg10[%c0_90, %c0_91], %101 {strides = array<i32>} : memref<8x1xf32, #tpu.memory_space<vmem>>, vector<8x1xf32>,
    } else {
    }
    %c1_i32 = arith.constant 1 : i32
    %8 = arith.cmpi eq, %arg0, %c1_i32 : i32
    %9 = arith.extui %8 : i1 to i32
    %c0_i32_4 = arith.constant 0 : i32
    %10 = arith.cmpi ne, %9, %c0_i32_4 : i32
    scf.if %10 {
      %c0 = arith.constant 0 : index
      %c0_5 = arith.constant 0 : index
      %11 = vector.load %arg9[%c0, %c0_5] : memref<8x1xf32, #tpu.memory_space<vmem>>, vector<8x1xf32>
      %cst = arith.constant 4.8828125E-4 : f32
      %12 = vector.broadcast %cst : f32 to vector<8x1xf32>
      %13 = arith.mulf %11, %12 : vector<8x1xf32>
      %c0_6 = arith.constant 0 : index
      %c0_7 = arith.constant 0 : index
      %14 = vector.load %arg10[%c0_6, %c0_7] : memref<8x1xf32, #tpu.memory_space<vmem>>, vector<8x1xf32>
      %cst_8 = arith.constant 4.8828125E-4 : f32
      %15 = vector.broadcast %cst_8 : f32 to vector<8x1xf32>
      %16 = arith.mulf %14, %15 : vector<8x1xf32>
      %17 = arith.mulf %13, %13 : vector<8x1xf32>
      %18 = arith.subf %16, %17 : vector<8x1xf32>
      %c0_9 = arith.constant 0 : index
      %c0_10 = arith.constant 0 : index
      %19 = vector.load %arg5[%c0_9, %c0_10] : memref<8x1xf32, #tpu.memory_space<vmem>>, vector<8x1xf32>
      %cst_11 = arith.constant 9.99999974E-6 : f32
      %20 = vector.broadcast %cst_11 : f32 to vector<8x1xf32>
      %21 = arith.addf %18, %20 : vector<8x1xf32>
      %22 = math.rsqrt %21 : vector<8x1xf32>
      %23 = arith.mulf %19, %22 : vector<8x1xf32>
      %c0_12 = arith.constant 0 : index
      %c0_13 = arith.constant 0 : index
      %24 = vector.load %arg6[%c0_12, %c0_13] : memref<8x1xf32, #tpu.memory_space<vmem>>, vector<8x1xf32>
      %25 = arith.mulf %13, %23 : vector<8x1xf32>
      %26 = arith.subf %24, %25 : vector<8x1xf32>
      %27 = arith.index_cast %arg1 : i32 to index
      %c0_14 = arith.constant 0 : index
      %c0_15 = arith.constant 0 : index
      %c0_16 = arith.constant 0 : index
      %28 = vector.load %arg8[%27, %c0_14, %c0_15, %c0_16] : memref<2x4x8x256xf32, #tpu.memory_space<vmem>>, vector<1x1x8x256xf32>
      %29 = vector.shape_cast %28 : vector<1x1x8x256xf32> to vector<8x256xf32>
      %30 = vector.broadcast %23 : vector<8x1xf32> to vector<8x256xf32>
      %31 = arith.mulf %29, %30 : vector<8x256xf32>
      %32 = vector.broadcast %26 : vector<8x1xf32> to vector<8x256xf32>
      %33 = arith.addf %31, %32 : vector<8x256xf32>
      %cst_17 = arith.constant 0.000000e+00 : f32
      %34 = vector.broadcast %cst_17 : f32 to vector<8x256xf32>
      %35 = arith.cmpf oge, %33, %34 : vector<8x256xf32>
      %cst_18 = arith.constant 2.000000e-01 : f32
      %36 = vector.broadcast %cst_18 : f32 to vector<8x256xf32>
      %37 = arith.mulf %36, %33 : vector<8x256xf32>
      %38 = arith.select %35, %33, %37 : vector<8x256xi1>, vector<8x256xf32>
      %c0_19 = arith.constant 0 : index
      %c0_20 = arith.constant 0 : index
      %c0_21 = arith.constant 0 : index
      %c0_22 = arith.constant 0 : index
      %39 = vector.load %arg7[%c0_19, %c0_20, %c0_21, %c0_22] : memref<1x4x8x256xf32, #tpu.memory_space<vmem>>, vector<1x1x8x256xf32>
      %40 = vector.shape_cast %39 : vector<1x1x8x256xf32> to vector<8x256xf32>
      %41 = vector.shape_cast %38 : vector<8x256xf32> to vector<1x1x8x256xf32>
      tpu.vector_store %arg7[%c0_19, %c0_20, %c0_21, %c0_22], %41 {strides = array<i32>} : memref<1x4x8x256xf32, #tpu.memory_space<vmem>>, vector<1x1x8x256xf32>,
      %42 = arith.index_cast %arg1 : i32 to index
      %c1 = arith.constant 1 : index
      %c0_23 = arith.constant 0 : index
      %c0_24 = arith.constant 0 : index
      %43 = vector.load %arg8[%42, %c1, %c0_23, %c0_24] : memref<2x4x8x256xf32, #tpu.memory_space<vmem>>, vector<1x1x8x256xf32>
      %44 = vector.shape_cast %43 : vector<1x1x8x256xf32> to vector<8x256xf32>
      %45 = vector.broadcast %23 : vector<8x1xf32> to vector<8x256xf32>
      %46 = arith.mulf %44, %45 : vector<8x256xf32>
      %47 = vector.broadcast %26 : vector<8x1xf32> to vector<8x256xf32>
      %48 = arith.addf %46, %47 : vector<8x256xf32>
      %cst_25 = arith.constant 0.000000e+00 : f32
      %49 = vector.broadcast %cst_25 : f32 to vector<8x256xf32>
      %50 = arith.cmpf oge, %48, %49 : vector<8x256xf32>
      %cst_26 = arith.constant 2.000000e-01 : f32
      %51 = vector.broadcast %cst_26 : f32 to vector<8x256xf32>
      %52 = arith.mulf %51, %48 : vector<8x256xf32>
      %53 = arith.select %50, %48, %52 : vector<8x256xi1>, vector<8x256xf32>
      %c0_27 = arith.constant 0 : index
      %c1_28 = arith.constant 1 : index
      %c0_29 = arith.constant 0 : index
      %c0_30 = arith.constant 0 : index
      %54 = vector.load %arg7[%c0_27, %c1_28, %c0_29, %c0_30] : memref<1x4x8x256xf32, #tpu.memory_space<vmem>>, vector<1x1x8x256xf32>
      %55 = vector.shape_cast %54 : vector<1x1x8x256xf32> to vector<8x256xf32>
      %56 = vector.shape_cast %53 : vector<8x256xf32> to vector<1x1x8x256xf32>
      tpu.vector_store %arg7[%c0_27, %c1_28, %c0_29, %c0_30], %56 {strides = array<i32>} : memref<1x4x8x256xf32, #tpu.memory_space<vmem>>, vector<1x1x8x256xf32>,
      %57 = arith.index_cast %arg1 : i32 to index
      %c2 = arith.constant 2 : index
      %c0_31 = arith.constant 0 : index
      %c0_32 = arith.constant 0 : index
      %58 = vector.load %arg8[%57, %c2, %c0_31, %c0_32] : memref<2x4x8x256xf32, #tpu.memory_space<vmem>>, vector<1x1x8x256xf32>
      %59 = vector.shape_cast %58 : vector<1x1x8x256xf32> to vector<8x256xf32>
      %60 = vector.broadcast %23 : vector<8x1xf32> to vector<8x256xf32>
      %61 = arith.mulf %59, %60 : vector<8x256xf32>
      %62 = vector.broadcast %26 : vector<8x1xf32> to vector<8x256xf32>
      %63 = arith.addf %61, %62 : vector<8x256xf32>
      %cst_33 = arith.constant 0.000000e+00 : f32
      %64 = vector.broadcast %cst_33 : f32 to vector<8x256xf32>
      %65 = arith.cmpf oge, %63, %64 : vector<8x256xf32>
      %cst_34 = arith.constant 2.000000e-01 : f32
      %66 = vector.broadcast %cst_34 : f32 to vector<8x256xf32>
      %67 = arith.mulf %66, %63 : vector<8x256xf32>
      %68 = arith.select %65, %63, %67 : vector<8x256xi1>, vector<8x256xf32>
      %c0_35 = arith.constant 0 : index
      %c2_36 = arith.constant 2 : index
      %c0_37 = arith.constant 0 : index
      %c0_38 = arith.constant 0 : index
      %69 = vector.load %arg7[%c0_35, %c2_36, %c0_37, %c0_38] : memref<1x4x8x256xf32, #tpu.memory_space<vmem>>, vector<1x1x8x256xf32>
      %70 = vector.shape_cast %69 : vector<1x1x8x256xf32> to vector<8x256xf32>
      %71 = vector.shape_cast %68 : vector<8x256xf32> to vector<1x1x8x256xf32>
      tpu.vector_store %arg7[%c0_35, %c2_36, %c0_37, %c0_38], %71 {strides = array<i32>} : memref<1x4x8x256xf32, #tpu.memory_space<vmem>>, vector<1x1x8x256xf32>,
      %72 = arith.index_cast %arg1 : i32 to index
      %c3 = arith.constant 3 : index
      %c0_39 = arith.constant 0 : index
      %c0_40 = arith.constant 0 : index
      %73 = vector.load %arg8[%72, %c3, %c0_39, %c0_40] : memref<2x4x8x256xf32, #tpu.memory_space<vmem>>, vector<1x1x8x256xf32>
      %74 = vector.shape_cast %73 : vector<1x1x8x256xf32> to vector<8x256xf32>
      %75 = vector.broadcast %23 : vector<8x1xf32> to vector<8x256xf32>
      %76 = arith.mulf %74, %75 : vector<8x256xf32>
      %77 = vector.broadcast %26 : vector<8x1xf32> to vector<8x256xf32>
      %78 = arith.addf %76, %77 : vector<8x256xf32>
      %cst_41 = arith.constant 0.000000e+00 : f32
      %79 = vector.broadcast %cst_41 : f32 to vector<8x256xf32>
      %80 = arith.cmpf oge, %78, %79 : vector<8x256xf32>
      %cst_42 = arith.constant 2.000000e-01 : f32
      %81 = vector.broadcast %cst_42 : f32 to vector<8x256xf32>
      %82 = arith.mulf %81, %78 : vector<8x256xf32>
      %83 = arith.select %80, %78, %82 : vector<8x256xi1>, vector<8x256xf32>
      %c0_43 = arith.constant 0 : index
      %c3_44 = arith.constant 3 : index
      %c0_45 = arith.constant 0 : index
      %c0_46 = arith.constant 0 : index
      %84 = vector.load %arg7[%c0_43, %c3_44, %c0_45, %c0_46] : memref<1x4x8x256xf32, #tpu.memory_space<vmem>>, vector<1x1x8x256xf32>
      %85 = vector.shape_cast %84 : vector<1x1x8x256xf32> to vector<8x256xf32>
      %86 = vector.shape_cast %83 : vector<8x256xf32> to vector<1x1x8x256xf32>
      tpu.vector_store %arg7[%c0_43, %c3_44, %c0_45, %c0_46], %86 {strides = array<i32>} : memref<1x4x8x256xf32, #tpu.memory_space<vmem>>, vector<1x1x8x256xf32>,
    } else {
    }
    return
  }
  func.func @transform_0(%arg0: i32, %arg1: i32) -> (i32, i32, i32, i32) {
    %c1_i32 = arith.constant 1 : i32
    %0 = arith.subi %c1_i32, %arg0 : i32
    %1 = arith.muli %arg1, %0 : i32
    %c1_i32_0 = arith.constant 1 : i32
    %2 = arith.muli %c1_i32_0, %arg0 : i32
    %3 = arith.addi %1, %2 : i32
    %c0_i32 = arith.constant 0 : i32
    %c0_i32_1 = arith.constant 0 : i32
    %c0_i32_2 = arith.constant 0 : i32
    %c0_i32_3 = arith.constant 0 : i32
    return %3, %c0_i32, %c0_i32_1, %c0_i32_2 : i32, i32, i32, i32
  }
  func.func @transform_1(%arg0: i32, %arg1: i32) -> (i32, i32, i32) {
    %c0_i32 = arith.constant 0 : i32
    %c0_i32_0 = arith.constant 0 : i32
    %c0_i32_1 = arith.constant 0 : i32
    %c0_i32_2 = arith.constant 0 : i32
    return %c0_i32, %c0_i32_0, %c0_i32_1 : i32, i32, i32
  }
  func.func @transform_2(%arg0: i32, %arg1: i32) -> (i32, i32) {
    %c0_i32 = arith.constant 0 : i32
    %c0_i32_0 = arith.constant 0 : i32
    %c0_i32_1 = arith.constant 0 : i32
    return %c0_i32, %c0_i32_0 : i32, i32
  }
  func.func @transform_3(%arg0: i32, %arg1: i32) -> (i32, i32) {
    %c0_i32 = arith.constant 0 : i32
    %c0_i32_0 = arith.constant 0 : i32
    %c0_i32_1 = arith.constant 0 : i32
    return %c0_i32, %c0_i32_0 : i32, i32
  }
  func.func @transform_4(%arg0: i32, %arg1: i32) -> (i32, i32) {
    %c0_i32 = arith.constant 0 : i32
    %c0_i32_0 = arith.constant 0 : i32
    %c0_i32_1 = arith.constant 0 : i32
    return %c0_i32, %c0_i32_0 : i32, i32
  }
  func.func @transform_5(%arg0: i32, %arg1: i32) -> (i32, i32, i32, i32) {
    %0 = arith.muli %arg1, %arg0 : i32
    %c0_i32 = arith.constant 0 : i32
    %c0_i32_0 = arith.constant 0 : i32
    %c0_i32_1 = arith.constant 0 : i32
    %c0_i32_2 = arith.constant 0 : i32
    return %0, %c0_i32, %c0_i32_0, %c0_i32_1 : i32, i32, i32, i32
  }
}

</mosaic_0001>

<bundles_post_ra>
// kernel: tpu_custom_call.1
= control target key start
LH: loop header
LB: loop body
LE: loop exit
PB: predicated region body
PF: predicated region fallthrough
CT: control target
= control target key end

     0   :  { %s1551_s0 = inlined_call_operand.hbm [shape: bf16[2,4,16,256], index: 0, kind: input, shape index: {}]   ;;  %s1552_s1 = inlined_call_operand.vmem [shape: bf16[4,8,16], index: 1, kind: input, shape index: {}]   ;;  %s1553_s2 = inlined_call_operand.vmem [shape: f32[8,1], index: 2, kind: input, shape index: {}]   ;;  %s1554_s3 = inlined_call_operand.vmem [shape: f32[8,1], index: 3, kind: input, shape index: {}]   ;;  %s1555_s4 = inlined_call_operand.vmem [shape: f32[8,1], index: 4, kind: input, shape index: {}]   ;;  %s1556_s5 = inlined_call_operand.hbm [shape: f32[2,4,8,256], index: 5, kind: output, shape index: {}]  }
   0x1   :  { %1562 = sst [smem:[#allocation14_spill]] %s1556_s5 }
   0x2   :  { %10 = vsyncpa [#allocation6], 0 }
   0x3   :  { %12 = vsyncpa [#allocation6 + $0x1], 0 }
   0x4   :  { %13 = vsyncpa [#allocation7], 0 }
   0x5   :  { %15 = vsyncpa [#allocation7 + $0x1], 0  ;;  %s1246_s18 = smov 0   ;;  %s1248_s19 = smov 0  }
   0x6   :  { %s1250_s20 = smov 0   ;;  %s1252_s21 = smov 0  }
   0x7   :  { %s1254_s22 = smov 0   ;;  %s1256_s23 = smov 0  }
   0x8   :  { %s1258_s24 = smov 0   ;;  %s1260_s25 = smov 0  }
   0x9   :  { %s1262_s26 = smov 0   ;;  %s1264_s27 = smov 0  }
   0xa   :  { %s1266_s28 = smov 0  }
   0xb LB: > { %1563 = sst [smem:[#allocation11_spill]] %s1197_s26  ;;  %s845_s29 = sadd.s32 4294967295, %s1205_s28   ;;  %s1205_s28 = sphi %s1266_s28, %s21_s28   ;;  %s1201_s27 = sphi %s1264_s27, %s1584_s27   ;;  %s1197_s26 = sphi %s1262_s26, %s1577_s26   ;;  %s1193_s25 = sphi %s1260_s25, %s1576_s25   ;;  %s1189_s24 = sphi %s1258_s24, %s1575_s24   ;;  %s1185_s23 = sphi %s1256_s23, %s1583_s23   ;;  %s1181_s22 = sphi %s1254_s22, %s1582_s22   ;;  %s1177_s21 = sphi %s1252_s21, %s1581_s21   ;;  %s1173_s20 = sphi %s1250_s20, %s1580_s20   ;;  %s1169_s19 = sphi %s1248_s19, %s1579_s19   ;;  %s1165_s18 = sphi %s1246_s18, %s1578_s18  }
   0xc   : > { %1564 = sst [smem:[#allocation12_spill]] %s1201_s27  ;;  %s30_s6 = sadd.s32 1, %s1197_s26 }
   0xd   : > { %s33_s7 = sadd.s32 1, %s1201_s27  ;;  %p31_p0 = scmp.ge.s32.totalorder %s30_s6, 2 }
   0xe   : > { %s37_s8 = ssub.s32 1, %s1201_s27  ;;  %s46_s10 = sadd.s32 1, %s1185_s23 }
   0xf   : > { %s38_s9 = smul.u32 %s1197_s26, %s37_s8  ;;  %s1586_s6 = smov (%p31_p0, %s30_s6), 0 }
  0x10   : > { %1565 = sst [smem:[#allocation13_spill]] %s1586_s6  ;;  %s1588_s7 = smov (!%p31_p0, %s33_s7), %s1201_s27 }
  0x11   : > { %s1310_s11 = sadd.s32 %s1201_s27, %s38_s9  ;;  %p53_p1 = scmp.ne.s32.totalorder %s1185_s23, %s1181_s22 }
  0x12   : > { %p35_p2 = scmp.ge.s32.totalorder %s1588_s7, 2  ;;  %p54_p3 = scmp.eq.s32.totalorder %s1205_s28, 0 }
  0x13   : > { %p59_p4 = scmp.ne.s32.totalorder %s1181_s22, %s1177_s21  ;;  %p60_p5 = scmp.eq.s32.totalorder %s845_s29, 0 }
  0x14   : > { %s1590_s7 = smov (%p35_p2, %s1588_s7), 0  ;;  %p1318_p6 = por %p54_p3, %p53_p1 }
  0x15   : > { %p1322_p7 = por %p60_p5, %p59_p4  ;;  %s40_s14 = ssub.s32 1, %s1590_s7 }
  0x16   : > { %s153_s15 = smul.u32 %s1197_s26, %s1201_s27  ;;  %s158_s17 = sadd.s32 1, %s1173_s20 }
  0x17   : > { %s41_s16 = smul.u32 %s40_s14, %s1586_s6  ;;  %p168_p8 = scmp.ne.s32.totalorder %s1173_s20, %s1169_s19 }
  0x18   : > { %s154_s21 = smul.u32 %s1590_s7, %s1586_s6  ;;  %p169_p9 = scmp.eq.s32.totalorder %s845_s29, 3 }
  0x19   : > { %s42_s8 = sadd.s32 %s41_s16, %s1590_s7  ;;  %p174_p13 = scmp.ne.s32.totalorder %s1169_s19, %s1165_s18 }
  0x1a   : > { %s43_s9 = ssub.s32 %s1310_s11, %s42_s8  ;;  %s155_s30 = ssub.s32 %s153_s15, %s154_s21 }
  0x1b   : > { %p44_p10 = scmp.eq.s32.totalorder %s43_s9, 0  ;;  %p156_p11 = scmp.eq.s32.totalorder %s155_s30, 0 }
  0x1c   : > { %p1337_p12 = por %p169_p9, %p168_p8  ;;  %s1569_s26 = sadd.s32 4294967294, %s1205_s28  }
  0x1d   : > { %s1344_s27 = scalar_select %p44_p10, %s1185_s23, %s46_s10  }
  0x1e   : > { %s1568_s5 = scalar_select %p1337_p12, 1, 0 }
  0x1f   : > { %s1347_s14 = scalar_select %p156_p11, %s1173_s20, %s158_s17  }
  0x20   : > { %p175_p0 = scmp.eq.s32.totalorder %s1569_s26, 3  ;;  %p939_p1 = scmp.lt.s32.totalorder %s1205_s28, 4 }
  0x21   : > { %s207_s6 = sand.u32 1, %s1185_s23   ;;  %s917_s16 = sshll.u32 %s1310_s11, 10 }
  0x22   : > { %p1353_p2 = por %p175_p0, %p174_p13  ;;  %s849_s15 = sshll.u32 %s207_s6, 6 }
  0x23   : > { %s1361_s8 = scalar_lea.hbm %s1551_s0, %s917_s16  ;;  %s211_s10 = scalar_lea.vmem [#allocation5], %s849_s15 }
  0x24   : > { %s1570_s29 = scalar_select %p1353_p2, 1, 0 }
  0x25   : > { %s221_s17 = sshll.u32 %s211_s10, 4  ;;  %p1365_p3 = pnand %p939_p1, %p1318_p6  ;;  %s1369_s17 = int_to_ptr.vmem [resolvable:$true] %s221_s17 }
  0x26   : > { %s1371_s11 = scalar_lea.sflag [#allocation6], %s207_s6  ;;  %s1053_s9 = scalar_lea.hbm %s1361_s8, 1024 }
  0x27   : > { %p1054_p4 = scmp.ne.s32.totalorder %s1361_s8, %s1053_s9  ;;  %p1055_p5 = pneg %p1365_p3 }
  0x28   : > { %s1058_s16 = scalar_lea.hbm %s1551_s0, 2048  ;;  %p1059_p6 = scmp.lt.u32.totalorder %s1361_s8, %s1551_s0 }
  0x29   : > { %p1056_p8 = pnand %p1055_p5, %p1054_p4  ;;  %p1060_p10 = scmp.lt.u32.totalorder %s1058_s16, %s1053_s9 }
  0x2a   : > { %p1062_p13 = scmp.lt.u32.totalorder %s1053_s9, %s1361_s8 }
  0x2b   : > { %p1057_p9 = pneg %p1056_p8  ;;  %p1061_p11 = por %p1060_p10, %p1059_p6 }
  0x2d   : > { %p1063_p0 = por %p1062_p13, %p1061_p11 }
  0x2f   : > { %p1064_p1 = pnand %p1063_p0, %p1057_p9 }
  0x31   : > { %1067 = shalt.err (!%p1064_p1)
}
  0x32   : > { %s1068_s6 = scalar_lea.vmem %s1369_s17, 1024  ;;  %s1207_s10 = smov [#allocation5]  }
  0x33   : > { %p1069_p4 = scmp.ne.s32.totalorder %s1369_s17, %s1068_s6  ;;  %s1073_s15 = sshll.u32 %s1207_s10, 4  ;;  %s1074_s15 = int_to_ptr.vmem [resolvable:$false] %s1073_s15 }
  0x34   : > { %s1075_s12 = scalar_lea.vmem %s1074_s15, 2048  ;;  %p1076_p12 = scmp.lt.s32.totalorder %s1369_s17, %s1074_s15 }
  0x35   : > { %p1071_p8 = pnand %p1069_p4, %p1055_p5  ;;  %p1077_p6 = scmp.lt.s32.totalorder %s1075_s12, %s1068_s6 }
  0x37   : > { %p1072_p2 = pneg %p1071_p8  ;;  %p1078_p10 = por %p1077_p6, %p1076_p12 }
  0x39   : > { %p1079_p11 = pnand %p1078_p10, %p1072_p2 }
  0x3b   : > { %1082 = shalt.err (!%p1079_p11)
}
  0x3c   : > { %s1208_s9 = smov 128   ;;  %s1209_s16 = smov 8  }
  0x3d   : > { %934 = dma.hbm_to_vmem [thread:$0]  (!%p1365_p3), %s1361_s8, 1024, %s1369_s17, %s1371_s11, %s1208_s9, %s1208_s9, %s1209_s16  }
  0x3e   : > { %p852_p5 = scmp.ge.s32.totalorder %s1205_s28, 1  ;;  %p229_p9 = scmp.lt.s32.totalorder %s1205_s28, 5 }
  0x40   : > { %p230_p13 = pnand %p852_p5, %p229_p9 }
  0x41   : > { %s235_s30 = sand.u32 (!%p230_p13), 1, %s1181_s22  }
  0x42   : > { %233 = sbr.rel (%p230_p13) target bundleno = 685 (0x2ad), region = 40  ;;  %s853_s21 = sshll.u32 (!%p230_p13), %s235_s30, 6 }
  0x43   : > { %s236_s6 = scalar_lea.sflag (!%p230_p13), [#allocation6], %s235_s30  ;;  %s1402_s10 = scalar_lea.vmem (!%p230_p13), [#allocation5], %s853_s21 }
  0x49   : > { %1156 = dma.done.wait (%p1322_p7), %s236_s6, 1024  }
  0x4a   : > { %1158 = vsyncadd (%p1322_p7), %s236_s6, 4294966272  ;;  %s263_s8 = sand.u32 1, %s1169_s19   ;;  %p271_p12 = scmp.eq.s32.totalorder %s1193_s25, 0 }
  0x4b   : > { %s854_s17 = sshll.u32 %s263_s8, 6  ;;  %p272_p2 = scmp.eq.s32.totalorder %s1189_s24, 0 }
  0x4c   : > { %s1413_s26 = scalar_lea.vmem [#allocation8], %s854_s17 }
  0x4d   : > { %p273_p3 = pnand %p272_p2, %p271_p12 }
  0x4e   : > { %vm277_vm0 = vcmask (!%p273_p3), 7168   ;;  %v1210_v0 = vmov (!%p273_p3), 0.0  }
  0x4f   : > { %276 = sbr.rel (%p273_p3) target bundleno = 86 (0x56), region = 48  ;;  %278 = vst.msk [vmem:[#allocation3] sm:$0xff] (!%p273_p3), %vm277_vm0, %v1210_v0  ;;  %279 = vst.msk [vmem:[#allocation4] sm:$0xff] (!%p273_p3), %vm277_vm0, %v1210_v0 }
  0x56 PF: > { %p855_p7 = scmp.ne.s32.totalorder %s1193_s25, 0 }
  0x57   : > { %v1038_v1 = vld [vmem:[%s1402_s10 + $0x4] ss:$8 sps:$4 sm:$0xff] (!%p855_p7)   ;;  %v1040_v2 = vld [vmem:[%s1402_s10 + $0x14] ss:$8 sps:$4 sm:$0xff] (!%p855_p7)   ;;  %v1211_v3 = vmov (!%p855_p7), 0   ;;  %vm302_vm1 = vcmask (!%p855_p7), 130048  }
  0x58   : > { %282 = sbr.rel (%p855_p7) target bundleno = 488 (0x1e8), region = 52  ;;  %338 = vmatprep.mubr.bf16.mxu0 (!%p855_p7), %v1211_v3  ;;  %423 = vmatprep.mubr.bf16.mxu1 (!%p855_p7), %v1211_v3  ;;  %v1042_v4 = vld [vmem:[%s1402_s10] ss:$8 sps:$4 sm:$0xff] (!%p855_p7)   ;;  %v1043_v5 = vld [vmem:[%s1402_s10 + $0x10] ss:$8 sps:$4 sm:$0xff] (!%p855_p7)   ;;  %s918_s17 = sshll.u32 (!%p855_p7), %s1189_s24, 6 }
  0x59   : > { %306 = vmatprep.subr.bf16.mxu0 (!%p855_p7), %v1038_v1  ;;  %1036 = vset.pattern.permute.xlu0 (!%p855_p7), %v1211_v3  ;;  %v283_v6 = vld [vmem:[%s1552_s1] sm:$0xf] (!%p855_p7)  ;;  %v861_v7 = vld [vmem:[%s1552_s1 + $0x4] sm:$0xf] (!%p855_p7)  ;;  %v1044_v8 = vld [vmem:[%s1402_s10 + $0x20] ss:$8 sps:$4 sm:$0xff] (!%p855_p7)  }
  0x5a   : > { %391 = vmatprep.subr.bf16.mxu1 (!%p855_p7), %v1040_v2  ;;  %1037 = vset.pattern.permute.xlu1 (!%p855_p7), %v1211_v3  ;;  %v1046_v9 = vld [vmem:[%s1402_s10 + $0x24] ss:$8 sps:$4 sm:$0xff] (!%p855_p7)   ;;  %v1047_v10 = vld [vmem:[%s1402_s10 + $0x30] ss:$8 sps:$4 sm:$0xff] (!%p855_p7)   ;;  %v1049_v11 = vld [vmem:[%s1402_s10 + $0x34] ss:$8 sps:$4 sm:$0xff] (!%p855_p7)  }
  0x5b   : > { %307 = vmatpush1.bf16.msra.mxu0 (!%p855_p7), %v1042_v4  ;;  %392 = vmatpush1.bf16.msra.mxu1 (!%p855_p7), %v1043_v5  ;;  %v286_v12 = vld [vmem:[%s1553_s2] sm:$0xff] (!%p855_p7)  ;;  %v871_v13 = vld [vmem:[%s1552_s1 + $0x8] sm:$0xf] (!%p855_p7)  ;;  %v881_v14 = vld [vmem:[%s1552_s1 + $0xc] sm:$0xf] (!%p855_p7)  ;;  %s1444_s13 = scalar_lea.vmem (!%p855_p7), [#allocation2], %s918_s17 }
  0x5c   : > { %475 = vmatprep.subr.bf16.mxu0 (!%p855_p7), %v1046_v9  ;;  %559 = vmatprep.subr.bf16.mxu1 (!%p855_p7), %v1049_v11  ;;  %v352_v59 = vld [vmem:[#allocation3] sm:$0xff] (!%p855_p7)  ;;  %vm357_vm2 = vcmask (!%p855_p7), 7168   ;;  %v359_v61 = vld [vmem:[#allocation4] sm:$0xff] (!%p855_p7) }
  0x5d   : > { %289 = vperm.xlu0 (!%p855_p7), %1036, %v286_v12   ;;  %459 = vperm.xlu1 (!%p855_p7), %1037, %v286_v12  }
  0x5e   : > { %858 = vmatmul.mubr.msk.bf16.vlgmr.msra.gmra.mrb[0].mxu0 (!%p855_p7), %vm302_vm1, %v283_v6  ;;  %866 = vmatmul.mubr.msk.bf16.vlgmr.msra.gmra.mrb[0].mxu1 (!%p855_p7), %vm302_vm1, %v861_v7 }
  0x5f   : > { %476 = vmatpush1.bf16.msra.mxu0 %v1044_v8  ;;  %507 = vmatprep.mubr.bf16.mxu0 %v1211_v3 }
  0x60   : > { %591 = vmatprep.mubr.bf16.mxu1 %v1211_v3  ;;  %560 = vmatpush1.bf16.msra.mxu1 %v1047_v10 }
  0x61   : > { %375 = vperm.xlu0 %1036, %v286_v12   ;;  %543 = vperm.xlu1 %1037, %v286_v12  }
  0x66   : > { %876 = vmatmul.mubr.msk.bf16.vlgmr.msra.gmra.mrb[4].mxu0 %vm302_vm1, %v871_v13  ;;  %886 = vmatmul.mubr.msk.bf16.vlgmr.msra.gmra.mrb[4].mxu1 %vm302_vm1, %v881_v14 }
  0xdc   : > { %v290_v15 = vpop.permute.xlu0 %289  ;;  %v460_v17 = vpop.permute.xlu1 %459 }
  0xe0   : > { %v376_v16 = vpop.permute.xlu0 %375  ;;  %v544_v38 = vpop.permute.xlu1 %543 }
 0x131   : > { %v340_v18 = vpop.f32.mrb[0].mxu0  ;;  %v425_v19 = vpop.f32.mrb[0].mxu1 }
 0x132   : > { %v341_v20 = vadd.f32 %v340_v18, %v290_v15  ;;  %v427_v21 = vpop.f32.mrb[1].mxu1  ;;  %v426_v22 = vadd.f32 %v425_v19, %v376_v16  ;;  %v342_v23 = vpop.f32.mrb[1].mxu0 }
 0x133   : > { %v428_v24 = vadd.f32 %v427_v21, %v376_v16  ;;  %v343_v25 = vadd.f32 %v342_v23, %v290_v15  ;;  %v344_v26 = vpop.f32.mrb[2].mxu0  ;;  %v429_v27 = vpop.f32.mrb[2].mxu1 }
 0x134   : > { %350 = vst [vmem:[%s1444_s13] sm:$0xff] %v341_v20  ;;  %869 = vst [vmem:[%s1444_s13 + $0x10] sm:$0xff] %v426_v22  ;;  %v345_v28 = vpop.f32.mrb[3].mxu0  ;;  %v430_v29 = vpop.f32.mrb[3].mxu1  ;;  %v360_v30 = vmul.f32 %v341_v20, %v341_v20  ;;  %v444_v31 = vmul.f32 %v426_v22, %v426_v22 }
 0x135   : > { %870 = vst [vmem:[%s1444_s13 + $0x18] sm:$0xff] %v428_v24  ;;  %351 = vst [vmem:[%s1444_s13 + $0x8] sm:$0xff] %v343_v25  ;;  %v353_v32 = vadd.f32 %v343_v25, %v341_v20  ;;  %v361_v33 = vmul.f32 %v343_v25, %v343_v25  ;;  %v438_v34 = vadd.f32 %v428_v24, %v426_v22 }
 0x136   : > { %v445_v35 = vmul.f32 %v428_v24, %v428_v24 }
 0x137   : > { %354 = vadd.xlane.f32.xlu0 %v353_v32  ;;  %v362_v36 = vadd.f32 %v361_v33, %v360_v30 }
 0x138   : > { %v446_v37 = vadd.f32 %v445_v35, %v444_v31 }
 0x139   : > { %363 = vadd.xlane.f32.xlu1 %v362_v36  ;;  %v509_v39 = vpop.f32.mrb[4].mxu0  ;;  %v593_v40 = vpop.f32.mrb[4].mxu1 }
 0x13a   : > { %v510_v41 = vadd.f32 %v509_v39, %v460_v17  ;;  %v511_v42 = vpop.f32.mrb[5].mxu0  ;;  %v594_v43 = vadd.f32 %v593_v40, %v544_v38  ;;  %v595_v44 = vpop.f32.mrb[5].mxu1 }
 0x13b   : > { %439 = vadd.xlane.f32.xlu0 %v438_v34  ;;  %v512_v45 = vadd.f32 %v511_v42, %v460_v17  ;;  %v513_v46 = vpop.f32.mrb[6].mxu0  ;;  %v596_v47 = vadd.f32 %v595_v44, %v544_v38  ;;  %v597_v48 = vpop.f32.mrb[6].mxu1 }
 0x13c   : > { %879 = vst [vmem:[%s1444_s13 + $0x20] sm:$0xff] %v510_v41  ;;  %v514_v49 = vpop.f32.mrb[7].mxu0  ;;  %889 = vst [vmem:[%s1444_s13 + $0x30] sm:$0xff] %v594_v43  ;;  %v528_v50 = vmul.f32 %v510_v41, %v510_v41  ;;  %v612_v51 = vmul.f32 %v594_v43, %v594_v43  ;;  %v598_v52 = vpop.f32.mrb[7].mxu1 }
 0x13d   : > { %880 = vst [vmem:[%s1444_s13 + $0x28] sm:$0xff] %v512_v45  ;;  %890 = vst [vmem:[%s1444_s13 + $0x38] sm:$0xff] %v596_v47  ;;  %v522_v53 = vadd.f32 %v512_v45, %v510_v41  ;;  %v529_v54 = vmul.f32 %v512_v45, %v512_v45  ;;  %v606_v55 = vadd.f32 %v596_v47, %v594_v43 }
 0x13e   : > { %v613_v56 = vmul.f32 %v596_v47, %v596_v47 }
 0x13f   : > { %447 = vadd.xlane.f32.xlu0 %v446_v37  ;;  %523 = vadd.xlane.f32.xlu1 %v522_v53  ;;  %v530_v57 = vadd.f32 %v529_v54, %v528_v50 }
 0x140   : > { %v614_v58 = vadd.f32 %v613_v56, %v612_v51 }
 0x143   : > { %531 = vadd.xlane.f32.xlu0 %v530_v57  ;;  %607 = vadd.xlane.f32.xlu1 %v606_v55 }
 0x147   : > { %615 = vadd.xlane.f32.xlu0 %v614_v58 }
 0x1c4   : > { %v355_v60 = vpop.xlane.xlu0 %354 }
 0x1c5   : > { %v356_v62 = vadd.f32 %v355_v60, %v352_v59 }
 0x1c6   : > { %v364_v63 = vpop.xlane.xlu1 %363 }
 0x1c7   : > { %358 = vst.msk [vmem:[#allocation3] sm:$0xff] %vm357_vm2, %v356_v62  ;;  %v365_v0 = vadd.f32 %v364_v63, %v359_v61 }
 0x1c8   : > { %v440_v1 = vpop.xlane.xlu0 %439 }
 0x1c9   : > { %366 = vst.msk [vmem:[#allocation4] sm:$0xff] %vm357_vm2, %v365_v0 }
 0x1cc   : > { %v448_v5 = vpop.xlane.xlu0 %447  ;;  %v524_v7 = vpop.xlane.xlu1 %523 }
 0x1ce   : > { %v437_v2 = vld [vmem:[#allocation3] sm:$0xff] }
 0x1cf   : > { %v441_v3 = vadd.f32 %v440_v1, %v437_v2 }
 0x1d0   : > { %v443_v4 = vld [vmem:[#allocation4] sm:$0xff]  ;;  %v532_v11 = vpop.xlane.xlu0 %531  ;;  %v608_v13 = vpop.xlane.xlu1 %607 }
 0x1d1   : > { %442 = vst.msk [vmem:[#allocation3] sm:$0xff] %vm357_vm2, %v441_v3  ;;  %v449_v6 = vadd.f32 %v448_v5, %v443_v4 }
 0x1d3   : > { %450 = vst.msk [vmem:[#allocation4] sm:$0xff] %vm357_vm2, %v449_v6 }
 0x1d4   : > { %v616_v17 = vpop.xlane.xlu0 %615 }
 0x1d8   : > { %v521_v8 = vld [vmem:[#allocation3] sm:$0xff] }
 0x1d9   : > { %v525_v9 = vadd.f32 %v524_v7, %v521_v8 }
 0x1da   : > { %v527_v10 = vld [vmem:[#allocation4] sm:$0xff] }
 0x1db   : > { %526 = vst.msk [vmem:[#allocation3] sm:$0xff] %vm357_vm2, %v525_v9  ;;  %v533_v12 = vadd.f32 %v532_v11, %v527_v10 }
 0x1dd   : > { %534 = vst.msk [vmem:[#allocation4] sm:$0xff] %vm357_vm2, %v533_v12 }
 0x1e2   : > { %v605_v14 = vld [vmem:[#allocation3] sm:$0xff] }
 0x1e3   : > { %v609_v15 = vadd.f32 %v608_v13, %v605_v14 }
 0x1e4   : > { %v611_v16 = vld [vmem:[#allocation4] sm:$0xff] }
 0x1e5   : > { %610 = vst.msk [vmem:[#allocation3] sm:$0xff] %vm357_vm2, %v609_v15  ;;  %v617_v18 = vadd.f32 %v616_v17, %v611_v16 }
 0x1e7   : > { %618 = vst.msk [vmem:[#allocation4] sm:$0xff] %vm357_vm2, %v617_v18 }
 0x1e8 PF: > { %p891_p0 = scmp.ne.s32.totalorder %s1193_s25, 1 }
 0x1e9   : > { %v1212_v21 = vmov (!%p891_p0), 0   ;;  %v629_v27 = vld [vmem:[%s1554_s3] sm:$0xff] (!%p891_p0)  ;;  %s922_s16 = sshll.u32 (!%p891_p0), %s1189_s24, 6 }
 0x1ea   : > { %622 = sbr.rel (%p891_p0) target bundleno = 657 (0x291), region = 56  ;;  %1050 = vset.pattern.permute.xlu0 (!%p891_p0), %v1212_v21  ;;  %v633_v30 = vld [vmem:[%s1555_s4] sm:$0xff] (!%p891_p0)  ;;  %s638_s30 = scalar_lea.vmem (!%p891_p0), [#allocation2], %s922_s16 }
 0x1eb   : > { %v639_v33 = vld [vmem:[%s638_s30] sm:$0xff] (!%p891_p0)  ;;  %v640_v34 = vld [vmem:[%s638_s30 + $0x8] sm:$0xff] (!%p891_p0)  ;;  %v896_v36 = vld [vmem:[%s638_s30 + $0x10] sm:$0xff] (!%p891_p0) }
 0x1ec   : > { %v623_v19 = vld [vmem:[#allocation3] sm:$0xff] (!%p891_p0)  ;;  %v897_v37 = vld [vmem:[%s638_s30 + $0x18] sm:$0xff] (!%p891_p0)  ;;  %v903_v39 = vld [vmem:[%s638_s30 + $0x28] sm:$0xff] (!%p891_p0) }
 0x1ed   : > { %v624_v22 = vmul.f32 (!%p891_p0), 0.00048828125, %v623_v19  ;;  %v902_v38 = vld [vmem:[%s638_s30 + $0x20] sm:$0xff] (!%p891_p0)  ;;  %v908_v40 = vld [vmem:[%s638_s30 + $0x30] sm:$0xff] (!%p891_p0)  ;;  %v909_v41 = vld [vmem:[%s638_s30 + $0x38] sm:$0xff] (!%p891_p0) }
 0x1ee   : > { %v625_v20 = vld [vmem:[#allocation4] sm:$0xff] (!%p891_p0) }
 0x1ef   : > { %v626_v23 = vmul.f32 (!%p891_p0), 0.00048828125, %v625_v20  ;;  %v627_v24 = vmul.f32 (!%p891_p0), %v624_v22, %v624_v22 }
 0x1f1   : > { %v628_v25 = vsub.f32 %v626_v23, %v627_v24 }
 0x1f3   : > { %v630_v26 = vadd.f32 1e-05, %v628_v25 }
 0x1f5   : > { %1051 = vrsqrt.f32 %v630_v26 }
 0x1ff   : > { %v1052_v28 = vpop.eup %1051 }
 0x200   : > { %v632_v29 = vmul.f32 %v1052_v28, %v629_v27 }
 0x202   : > { %643 = vperm.xlu0 %1050, %v632_v29   ;;  %v634_v31 = vmul.f32 %v632_v29, %v624_v22 }
 0x204   : > { %v635_v32 = vsub.f32 %v633_v30, %v634_v31 }
 0x206   : > { %650 = vperm.xlu0 %1050, %v635_v32  }
 0x281   : > { %v644_v35 = vpop.permute.xlu0 %643 }
 0x282   : > { %v646_v42 = vmul.f32 %v644_v35, %v639_v33  ;;  %v647_v43 = vmul.f32 %v644_v35, %v640_v34  ;;  %v668_v44 = vmul.f32 %v896_v36, %v644_v35  ;;  %v669_v45 = vmul.f32 %v897_v37, %v644_v35 }
 0x283   : > { %v686_v46 = vmul.f32 %v902_v38, %v644_v35  ;;  %v687_v47 = vmul.f32 %v903_v39, %v644_v35  ;;  %v704_v48 = vmul.f32 %v908_v40, %v644_v35  ;;  %v705_v49 = vmul.f32 %v909_v41, %v644_v35 }
 0x285   : > { %v651_v50 = vpop.permute.xlu0 %650 }
 0x286   : > { %v653_v51 = vadd.f32 %v651_v50, %v646_v42  ;;  %v654_v52 = vadd.f32 %v651_v50, %v647_v43  ;;  %v670_v53 = vadd.f32 %v668_v44, %v651_v50  ;;  %v671_v54 = vadd.f32 %v669_v45, %v651_v50 }
 0x287   : > { %v688_v55 = vadd.f32 %v686_v46, %v651_v50  ;;  %v689_v56 = vadd.f32 %v687_v47, %v651_v50  ;;  %v706_v57 = vadd.f32 %v704_v48, %v651_v50  ;;  %v707_v58 = vadd.f32 %v705_v49, %v651_v50 }
 0x288   : > { %vm655_vm3 = vcmp.ge.f32.partialorder %v653_v51, 0.0  ;;  %vm656_vm4 = vcmp.ge.f32.partialorder %v654_v52, 0.0  ;;  %v657_v59 = vmul.f32 0.2, %v653_v51  ;;  %v658_v60 = vmul.f32 0.2, %v654_v52 }
 0x289   : > { %vm672_vm5 = vcmp.ge.f32.partialorder %v670_v53, 0.0  ;;  %vm673_vm6 = vcmp.ge.f32.partialorder %v671_v54, 0.0  ;;  %v674_v61 = vmul.f32 0.2, %v670_v53  ;;  %v675_v62 = vmul.f32 0.2, %v671_v54 }
 0x28a   : > { %v659_v63 = vsel %vm655_vm3, %v653_v51, %v657_v59  ;;  %v660_v0 = vsel %vm656_vm4, %v654_v52, %v658_v60  ;;  %vm690_vm7 = vcmp.ge.f32.partialorder %v688_v55, 0.0  ;;  %vm691_vm8 = vcmp.ge.f32.partialorder %v689_v56, 0.0 }
 0x28b   : > { %661 = vst [vmem:[%s1413_s26] sm:$0xff] %v659_v63  ;;  %662 = vst [vmem:[%s1413_s26 + $0x8] sm:$0xff] %v660_v0  ;;  %v676_v1 = vsel %vm672_vm5, %v670_v53, %v674_v61  ;;  %v677_v2 = vsel %vm673_vm6, %v671_v54, %v675_v62  ;;  %v692_v3 = vmul.f32 0.2, %v688_v55  ;;  %v693_v4 = vmul.f32 0.2, %v689_v56 }
 0x28c   : > { %898 = vst [vmem:[%s1413_s26 + $0x10] sm:$0xff] %v676_v1  ;;  %899 = vst [vmem:[%s1413_s26 + $0x18] sm:$0xff] %v677_v2  ;;  %vm708_vm9 = vcmp.ge.f32.partialorder %v706_v57, 0.0  ;;  %vm709_vm10 = vcmp.ge.f32.partialorder %v707_v58, 0.0  ;;  %v710_v5 = vmul.f32 0.2, %v706_v57 }
 0x28d   : > { %v711_v6 = vmul.f32 0.2, %v707_v58  ;;  %v694_v7 = vsel %vm690_vm7, %v688_v55, %v692_v3  ;;  %v695_v8 = vsel %vm691_vm8, %v689_v56, %v693_v4 }
 0x28e   : > { %904 = vst [vmem:[%s1413_s26 + $0x20] sm:$0xff] %v694_v7  ;;  %905 = vst [vmem:[%s1413_s26 + $0x28] sm:$0xff] %v695_v8  ;;  %v712_v9 = vsel %vm708_vm9, %v706_v57, %v710_v5 }
 0x28f   : > { %v713_v10 = vsel %vm709_vm10, %v707_v58, %v711_v6  ;;  %910 = vst [vmem:[%s1413_s26 + $0x30] sm:$0xff] %v712_v9 }
 0x290   : > { %911 = vst [vmem:[%s1413_s26 + $0x38] sm:$0xff] %v713_v10 }
 0x291 PF: > { %s725_s21 = smul.u32 %s1189_s24, %s1193_s25  ;;  %s732_s6 = sshll.u32 %s1413_s26, 4  ;;  %s1481_s6 = int_to_ptr.vmem [resolvable:$true] %s732_s6 }
 0x292   : > { %s1572_s11 = sld [smem:[#allocation14_spill]]  ;;  %s1490_s12 = scalar_lea.sflag [#allocation7], %s263_s8 }
 0x293   : > { %s926_s10 = sshll.u32 %s725_s21, 10  ;;  %s1083_s9 = scalar_lea.vmem %s1481_s6, 1024 }
 0x294   : > { %p1084_p1 = scmp.ne.s32.totalorder %s1481_s6, %s1083_s9  ;;  %p1573_p4 = scmp.ne.s32.totalorder %s1568_s5, 0 }
 0x295   : > { %s1213_s24 = smov [#allocation8]  }
 0x296   : > { %p1085_p8 = pnand %p1084_p1, %p1573_p4  ;;  %s1087_s25 = sshll.u32 %s1213_s24, 4  ;;  %s1088_s25 = int_to_ptr.vmem [resolvable:$false] %s1087_s25 }
 0x297   : > { %s1089_s26 = scalar_lea.vmem %s1088_s25, 2048  ;;  %p1090_p10 = scmp.lt.s32.totalorder %s1481_s6, %s1088_s25 }
 0x298   : > { %s1486_s15 = scalar_lea.hbm %s1572_s11, %s926_s10  ;;  %p1086_p6 = pneg %p1085_p8 }
 0x299   : > { %p1091_p11 = scmp.lt.s32.totalorder %s1089_s26, %s1083_s9 }
 0x29b   : > { %p1092_p5 = por %p1091_p11, %p1090_p10 }
 0x29d   : > { %p1093_p9 = pnand %p1092_p5, %p1086_p6 }
 0x29f   : > { %1096 = shalt.err (!%p1093_p9)
}
 0x2a0   : > { %s1097_s8 = scalar_lea.hbm %s1486_s15, 1024  ;;  %s1101_s21 = scalar_lea.hbm %s1572_s11, 2048 }
 0x2a1   : > { %p1098_p13 = scmp.ne.s32.totalorder %s1486_s15, %s1097_s8  ;;  %p1102_p3 = scmp.lt.u32.totalorder %s1486_s15, %s1572_s11 }
 0x2a2   : > { %p1103_p7 = scmp.lt.u32.totalorder %s1101_s21, %s1097_s8  ;;  %p1105_p1 = scmp.lt.u32.totalorder %s1097_s8, %s1486_s15 }
 0x2a3   : > { %p1099_p12 = pnand %p1098_p13, %p1573_p4 }
 0x2a4   : > { %p1104_p0 = por %p1103_p7, %p1102_p3 }
 0x2a5   : > { %p1100_p2 = pneg %p1099_p12 }
 0x2a6   : > { %p1106_p8 = por %p1105_p1, %p1104_p0 }
 0x2a8   : > { %p1107_p6 = pnand %p1106_p8, %p1100_p2 }
 0x2aa   : > { %1110 = shalt.err (!%p1107_p6)
}
 0x2ab   : > { %s1214_s13 = smov 256   ;;  %s1215_s9 = smov 16  }
 0x2ac   : > { %929 = dma.vmem_to_hbm [thread:$0]  (%p1573_p4), %s1481_s6, 1024, %s1486_s15, %s1490_s12, %s1214_s13, %s1214_s13, %s1215_s9  }
 0x2ad PF: > { %p940_p10 = scmp.ge.s32.totalorder %s1205_s28, 2  ;;  %s747_s24 = sand.u32 1, %s1165_s18  }
 0x2ae   : > { %p1574_p11 = scmp.ne.s32.totalorder %s1570_s29, 0  ;;  %s748_s25 = scalar_lea.sflag [#allocation7], %s747_s24 }
 0x2b0   : > { %p936_p5 = pnand %p940_p10, %p1574_p11 }
 0x2b2   : > { %1160 = dma.done.wait (!%p936_p5), %s748_s25, 1024  }
 0x2b3   : > { %1162 = vsyncadd (!%p936_p5), %s748_s25, 4294966272  ;;  %s21_s28 = sadd.s32 1, %s1205_s28   ;;  %s1575_s24 = sld [smem:[#allocation11_spill]] }
 0x2b4   : > { %p18_p9 = scmp.ge.s32.totalorder %s21_s28, 6   ;;  %s1576_s25 = sld [smem:[#allocation12_spill]] }
 0x2b5   : > { %s1577_s26 = sld [smem:[#allocation13_spill]]  ;;  %s1578_s18 = smov %s1169_s19 }
 0x2b6   : > { %s1579_s19 = smov %s1173_s20  ;;  %s1580_s20 = smov %s1347_s14 }
 0x2b7   : > { %s1581_s21 = smov %s1181_s22  ;;  %s1582_s22 = smov %s1185_s23 }
 0x2b8   : > { %s1583_s23 = smov %s1344_s27  ;;  %s1584_s27 = smov %s1590_s7 }
 0x2b9   :  { %20 = sbr.rel (!%p18_p9) target bundleno = 11 (0xb), region = 114 }
 0x2c0   :  { %753 = vsyncpa [#allocation6], 1 }
 0x2c1   :  { %755 = vsyncpa [#allocation6 + $0x1], 1 }
 0x2c2   :  { %756 = vsyncpa [#allocation7], 1 }
 0x2c3   :  { %758 = vsyncpa [#allocation7 + $0x1], 1 }

</bundles_post_ra>
